<compile_context>
chip_gen: v6e
topology: v6e:2x2x1
jax: 0.10.0
libtpu: 0.0.40
codegen_flags: <defaults>
</compile_context>

<pallas_src>
import functools

import jax
import jax.numpy as jnp
from jax import lax
from jax.experimental import pallas as pl
from jax.experimental.pallas import tpu as pltpu


# ----------------------------------------------------------------------------
# Small helpers
# ----------------------------------------------------------------------------
def _round_up(x, m):
    return (x + m - 1) // m * m


def _pad2(a, rows, cols):
    return jnp.pad(a, ((0, rows - a.shape[0]), (0, cols - a.shape[1])))


def _sanitize(x, lo, hi):
    # torch.nan_to_num(nan=0, posinf=hi, neginf=lo) followed by clamp(lo, hi).
    x = jnp.where(jnp.isnan(x), jnp.zeros_like(x), x)
    return jnp.clip(x, lo, hi)


def _vmem_budget_bytes():
    """~75% of the per-core VMEM capacity (generation-aware), safe fallback."""
    cap = 128 * 1024 * 1024
    try:
        cap = int(pltpu.get_tpu_info().vmem_capacity_bytes)
    except Exception:
        pass
    return (cap * 3) // 4


def _pick_tm(n_nodes):
    """256 fills the 256-wide MXU on v6e/v7x; 128 on v5e / tiny graphs."""
    tm = 128
    if n_nodes > 128:
        try:
            kind = jax.devices()[0].device_kind.lower()
            if ("v6" in kind) or ("v7" in kind):
                tm = 256
        except Exception:
            pass
    return tm


# ----------------------------------------------------------------------------
# Fused forward kernel
# ----------------------------------------------------------------------------
def _fused_forward(x_pad, a_pad, bn0_pack, w_stack, p_stack, wout_pack,
                   *, num_layers, tm, tk, a_resident, mm_dtype, budget):
    N_pad, D = x_pad.shape
    T = N_pad // tm
    Kt = N_pad // tk
    L = num_layers

    def kernel(x_ref, a_ref, bn0_ref, w_ref, p_ref, wout_ref, o_ref,
               acts_ref, acc_ref):
        s = pl.program_id(0)          # 0 = input BN, 1..L = GCN layers
        i = pl.program_id(1)          # destination-row tile
        k = pl.program_id(2)          # source-node (K) chunk of A @ X
        row0 = pl.multiple_of(i * tm, tm)

        # ---- stage 0: sanitize(combined) -> folded input BN ----------------
        @pl.when((s == 0) & (k == 0))
        def _():
            x = _sanitize(x_ref[...], -1e6, 1e6)
            y = x * bn0_ref[0:1, :] + bn0_ref[1:2, :]
            acts_ref[0, pl.ds(row0, tm), :] = (
                _sanitize(y, -10.0, 10.0).astype(mm_dtype))

        # ---- stages 1..L: GCNConv -> clamp -> BN -> clamp -> ReLU ----------
        @pl.when(s >= 1)
        def _():
            @pl.when(k == 0)
            def _():
                acc_ref[...] = jnp.zeros_like(acc_ref)

            src_idx = (s - 1) & 1
            col0 = pl.multiple_of(k * tk, tk)
            src = acts_ref[src_idx, pl.ds(col0, tk), :]            # (tk, D)
            if a_resident:
                a_blk = a_ref[pl.ds(row0, tm), pl.ds(col0, tk)]    # (tm, tk)
            else:
                a_blk = a_ref[...]                                 # (tm, tk)
            acc_ref[...] += jnp.dot(a_blk, src,
                                    preferred_element_type=jnp.float32)

            @pl.when(k == Kt - 1)
            def _():
                dst_idx = s & 1
                h = jnp.dot(acc_ref[...].astype(mm_dtype), w_ref[0],
                            preferred_element_type=jnp.float32)    # (tm, D)
                h = h + p_ref[0, 0:1, :]                           # GCN bias
                h = _sanitize(h, -10.0, 10.0)
                h = h * p_ref[0, 1:2, :] + p_ref[0, 2:3, :]        # folded BN
                h = jnp.clip(h, 0.0, 10.0)   # clamp(-10,10) + ReLU fused
                # TODO(synk): F.dropout(training=True) not implemented; eval mode => identity.
                acts_ref[dst_idx, pl.ds(row0, tm), :] = h.astype(mm_dtype)

                @pl.when(s == L)
                def _():
                    # Final Linear(hidden -> 1), emitted lane-dense as (1, tm).
                    y = lax.dot_general(
                        wout_ref[0:1, :], h,
                        (((1,), (1,)), ((), ())),
                        preferred_element_type=jnp.float32)        # (1, tm)
                    y = y + wout_ref[1:2, 0:1]                     # out bias
                    o_ref[...] = _sanitize(y, -10.0, 10.0).reshape(1, 1, tm)

    vmem = pltpu.MemorySpace.VMEM
    a_item = a_pad.dtype.itemsize
    w_item = w_stack.dtype.itemsize
    act_item = jnp.finfo(mm_dtype).bits // 8

    if a_resident:
        # Whole adjacency VMEM-resident: DMA'd from HBM exactly once.
        a_spec = pl.BlockSpec(memory_space=vmem)
    else:
        # Streamed (tm, tk) blocks; stage 0 (input BN) pins to block (0, 0) so
        # it never re-streams the adjacency.
        a_spec = pl.BlockSpec(
            (tm, tk),
            lambda s, i, k: (jnp.where(s == 0, 0, i), jnp.where(s == 0, 0, k)))

    x_spec = pl.BlockSpec((tm, D), lambda s, i, k: (jnp.where(s == 0, i, 0), 0))
    w_spec = pl.BlockSpec((1, D, D), lambda s, i, k: (jnp.maximum(s - 1, 0), 0, 0))
    p_spec = pl.BlockSpec((1, 3, D), lambda s, i, k: (jnp.maximum(s - 1, 0), 0, 0))
    # Only the final stage writes the output; earlier stages alias block 0.
    out_spec = pl.BlockSpec((1, 1, tm),
                            lambda s, i, k: (jnp.where(s == L, i, 0), 0, 0))

    # VMEM bound: scratches + double-buffered streamed blocks (+ resident A).
    est_vmem = (2 * N_pad * D * act_item          # ping-pong activations
                + tm * D * 4                      # A@X accumulator
                + (N_pad * N_pad * a_item if a_resident else 2 * tm * tk * a_item)
                + 2 * tm * D * 4                  # x blocks
                + 2 * D * D * w_item              # per-layer weights
                + (2 * 3 * D + 4 * D) * 4         # p / bn0 / wout
                + 2 * tm * 4)                     # output blocks
    vmem_limit = int(min(budget, max(32 * 1024 * 1024, int(1.5 * est_vmem))))

    flops = int(L * (2 * N_pad * N_pad * D + 2 * N_pad * D * D) + 16 * N_pad * D)
    bytes_accessed = int(
        N_pad * D * 4
        + (1 if a_resident else L) * N_pad * N_pad * a_item
        + L * D * D * w_item
        + (L * 3 * D + 4 * D) * 4
        + N_pad * 4)

    out = pl.pallas_call(
        kernel,
        out_shape=jax.ShapeDtypeStruct((T, 1, tm), jnp.float32),
        grid_spec=pltpu.PrefetchScalarGridSpec(
            num_scalar_prefetch=0,
            grid=(L + 1, T, Kt),
            in_specs=[
                x_spec,                                # combined features
                a_spec,                                # A_hat
                pl.BlockSpec(memory_space=vmem),       # bn0 scale/shift (2, D)
                w_spec,                                # weights     (L, D, D)
                p_spec,                                # bias/scale/shift (L,3,D)
                pl.BlockSpec(memory_space=vmem),       # out w + bias   (2, D)
            ],
            out_specs=out_spec,
            scratch_shapes=[pltpu.VMEM((2, N_pad, D), mm_dtype),   # ping-pong acts
                            pltpu.VMEM((tm, D), jnp.float32)],     # A@X accumulator
        ),
        compiler_params=pltpu.CompilerParams(
            # Stage axis is strictly sequential; each stage consumes activations
            # written by ALL row tiles of the previous stage, and the K axis
            # accumulates -> all "arbitrary".
            dimension_semantics=("arbitrary", "arbitrary", "arbitrary"),
            vmem_limit_bytes=vmem_limit,
        ),
        cost_estimate=pl.CostEstimate(
            flops=flops, transcendentals=0, bytes_accessed=bytes_accessed),
    )(x_pad, a_pad, bn0_pack, w_stack, p_stack, wout_pack)
    return out.reshape(N_pad)


# ----------------------------------------------------------------------------
# Glue (plain JAX): adjacency normalization, BN folding, parameter setup
# ----------------------------------------------------------------------------
def build_gcn_adjacency(edge_index, edge_weight, num_nodes):
    """Dense  A_hat[i, j] = d_i^-1/2 * w_{j->i} * d_j^-1/2  with self loops."""
    # TODO(synk): block-sparse A_hat (skip all-zero (tm, tk) blocks via scalar
    # prefetch) not implemented; A_hat is materialized densely.
    ew = jnp.where(jnp.isnan(edge_weight), 0.0, edge_weight)
    ew = jnp.clip(ew, 0.0, 1e6)
    row, col = edge_index[0], edge_index[1]          # source -> target
    loop = jnp.arange(num_nodes, dtype=row.dtype)
    row = jnp.concatenate([row, loop])
    col = jnp.concatenate([col, loop])
    ew = jnp.concatenate([ew, jnp.ones((num_nodes,), dtype=ew.dtype)])
    deg = jnp.zeros((num_nodes,), dtype=jnp.float32).at[col].add(ew)
    dinv = jnp.where(deg > 0, 1.0 / jnp.sqrt(deg), 0.0)
    norm = dinv[row] * ew * dinv[col]
    a_hat = jnp.zeros((num_nodes, num_nodes), dtype=jnp.float32)
    a_hat = a_hat.at[col, row].add(norm)             # rows = destination nodes
    return a_hat


def init_params(key, combined_dim, hidden_dim, gcn_layers):
    params = {}

    def bn(k, dim):
        k1, k2, k3, k4 = jax.random.split(k, 4)
        return dict(
            gamma=1.0 + 0.1 * jax.random.normal(k1, (1, dim), jnp.float32),
            beta=0.1 * jax.random.normal(k2, (1, dim), jnp.float32),
            mean=0.1 * jax.random.normal(k3, (1, dim), jnp.float32),
            var=1.0 + 0.1 * jax.random.uniform(k4, (1, dim), jnp.float32),
        )

    keys = jax.random.split(key, 3 + 3 * gcn_layers)
    params["input_bn"] = bn(keys[0], combined_dim)
    params["gcn"] = []
    in_dim = combined_dim
    for i in range(gcn_layers):
        kw, kb, kbn = keys[1 + 3 * i], keys[2 + 3 * i], keys[3 + 3 * i]
        params["gcn"].append(dict(
            w=0.1 * jax.random.normal(kw, (in_dim, hidden_dim), jnp.float32),
            b=0.05 * jax.random.normal(kb, (1, hidden_dim), jnp.float32),
            bn=bn(kbn, hidden_dim),
        ))
        in_dim = hidden_dim
    kw, kb = keys[-2], keys[-1]
    params["out"] = dict(
        w=0.1 * jax.random.normal(kw, (hidden_dim, 1), jnp.float32),
        b=0.05 * jax.random.normal(kb, (1, 1), jnp.float32),
    )
    return params


@functools.partial(jax.jit, static_argnames=("num_nodes", "mm_dtype"))
def spatio_temporal_gcn_forward(params, x_static, x_dynamic,
                                edge_index, edge_weight, num_nodes,
                                mm_dtype=jnp.bfloat16):
    L = len(params["gcn"])
    if L == 0:
        # TODO(synk): feature_combiner fallback branch (gcn_layers == 0 or
        # empty edge_index) not implemented.
        raise NotImplementedError("gcn_layers == 0 path not implemented")

    dyn_flat = x_dynamic.reshape(x_dynamic.shape[0], -1)
    combined = jnp.concatenate([x_static, dyn_flat], axis=1).astype(jnp.float32)
    N, C = combined.shape
    H = params["gcn"][0]["w"].shape[1]

    # Pad channels and nodes to full (8,128)-aligned tiles.
    D = _round_up(max(C, H), 128)
    tm = _pick_tm(N)
    N_pad = _round_up(max(N, tm), tm)

    # Generation-aware VMEM budget drives A residency / K-chunk size.
    budget = _vmem_budget_bytes()
    a_item = jnp.finfo(mm_dtype).bits // 8
    a_resident = (N_pad * N_pad * a_item) <= (budget // 3)
    if a_resident:
        tk = N_pad
    else:
        tk = next(t for t in (2048, 1024, 512, 256, 128) if N_pad % t == 0)

    x_pad = _pad2(combined, N_pad, D)
    a_hat = build_gcn_adjacency(edge_index, edge_weight, num_nodes)
    a_pad = _pad2(a_hat, N_pad, N_pad).astype(mm_dtype)

    def fold_bn(bn, width):
        scale = bn["gamma"] * lax.rsqrt(bn["var"] + 1e-5)
        shift = bn["beta"] - bn["mean"] * scale
        return _pad2(scale, 1, width), _pad2(shift, 1, width)

    s0, t0 = fold_bn(params["input_bn"], D)
    bn0_pack = jnp.concatenate([s0, t0], axis=0)                    # (2, D)

    w_list, p_list = [], []
    for layer in params["gcn"]:
        w_list.append(_pad2(layer["w"], D, D))
        sc, sh = fold_bn(layer["bn"], D)
        p_list.append(jnp.stack([_pad2(layer["b"], 1, D)[0], sc[0], sh[0]]))
    w_stack = jnp.stack(w_list).astype(mm_dtype)                    # (L, D, D)
    p_stack = jnp.stack(p_list)                                     # (L, 3, D)

    wout_row = _pad2(params["out"]["w"].T, 1, D)                    # (1, D)
    bias_row = jnp.zeros((1, D), jnp.float32).at[0, 0].set(
        params["out"]["b"][0, 0])
    wout_pack = jnp.concatenate([wout_row, bias_row], axis=0)       # (2, D)

    out = _fused_forward(x_pad, a_pad, bn0_pack, w_stack, p_stack, wout_pack,
                         num_layers=L, tm=tm, tk=tk, a_resident=a_resident,
                         mm_dtype=mm_dtype, budget=budget)
    return out[:N]


# Pure-JAX reference (same math, torch op order) for a correctness spot check.
def reference_forward(params, x_static, x_dynamic, edge_index, edge_weight,
                      num_nodes):
    def san(x, lo, hi):
        return jnp.clip(jnp.where(jnp.isnan(x), 0.0, x), lo, hi)

    dyn_flat = x_dynamic.reshape(x_dynamic.shape[0], -1)
    x = san(jnp.concatenate([x_static, dyn_flat], axis=1), -1e6, 1e6)
    bn0 = params["input_bn"]
    x = (x - bn0["mean"]) * lax.rsqrt(bn0["var"] + 1e-5) * bn0["gamma"] + bn0["beta"]
    x = san(x, -10.0, 10.0)
    a_hat = build_gcn_adjacency(edge_index, edge_weight, num_nodes)
    for layer in params["gcn"]:
        h = a_hat @ (x @ layer["w"]) + layer["b"]
        h = san(h, -10.0, 10.0)
        bn = layer["bn"]
        h = (h - bn["mean"]) * lax.rsqrt(bn["var"] + 1e-5) * bn["gamma"] + bn["beta"]
        x = jnp.maximum(san(h, -10.0, 10.0), 0.0)
    y = x @ params["out"]["w"] + params["out"]["b"]
    return san(y, -10.0, 10.0)[:, 0]


if __name__ == "__main__":
    # small, module-consistent shapes
    num_nodes = 16
    static_feature_dim = 4
    dynamic_feature_dim = 3
    sequence_length = 8
    hidden_dim = 32
    gcn_layers = 2
    combined_dim = static_feature_dim + dynamic_feature_dim * sequence_length  # 28

    key = jax.random.PRNGKey(0)
    k_static, k_dyn, k_ew, k_params = jax.random.split(key, 4)

    x_static = jax.random.normal(k_static, (num_nodes, static_feature_dim), jnp.float32)
    x_dynamic = jax.random.normal(
        k_dyn, (num_nodes, sequence_length, dynamic_feature_dim), jnp.float32)

    # ring graph (both directions) -> 2N edges, edge_index[0]=src, [1]=dst
    src = jnp.concatenate([jnp.arange(num_nodes), (jnp.arange(num_nodes) + 1) % num_nodes])
    dst = jnp.concatenate([(jnp.arange(num_nodes) + 1) % num_nodes, jnp.arange(num_nodes)])
    edge_index = jnp.stack([src, dst]).astype(jnp.int32)
    edge_weight = jax.random.uniform(k_ew, (edge_index.shape[1],), jnp.float32)

    params = init_params(k_params, combined_dim, hidden_dim, gcn_layers)

    ref = reference_forward(
        params, x_static, x_dynamic, edge_index, edge_weight, num_nodes)

    # Exact-precision path: matches the f32 reference at tight tolerance.
    out_f32 = jax.block_until_ready(spatio_temporal_gcn_forward(
        params, x_static, x_dynamic, edge_index, edge_weight, num_nodes,
        mm_dtype=jnp.float32))
    assert out_f32.shape == (num_nodes,)
    assert jnp.allclose(out_f32, ref, atol=2e-3, rtol=2e-3), (
        f"f32 max abs err = {jnp.max(jnp.abs(out_f32 - ref))}")

    # Default bf16 fast path: looser tolerance for bf16 matmul rounding.
    out_bf16 = jax.block_until_ready(spatio_temporal_gcn_forward(
        params, x_static, x_dynamic, edge_index, edge_weight, num_nodes,
        mm_dtype=jnp.bfloat16))
    assert out_bf16.shape == (num_nodes,)
    assert jnp.allclose(out_bf16, ref, atol=2e-2, rtol=2e-2), (
        f"bf16 max abs err = {jnp.max(jnp.abs(out_bf16 - ref))}")

    print("KERNEL_OK")
</pallas_src>

<mosaic_0001>
module attributes {stable_mosaic.version = 11 : i64} {
  func.func private @main(%arg0: i32) attributes {dimension_semantics = [#tpu.dimension_semantics<core_parallel>], iteration_bounds = array<i64: 2>, tpu.core_type = #tpu.core_type<sc_scalar_subcore>, window_params = []} {
    return
  }
}

module attributes {stable_mosaic.version = 11 : i64} {
  func.func private @main(%arg0: i32) attributes {dimension_semantics = [#tpu.dimension_semantics<core_parallel>], iteration_bounds = array<i64: 2>, tpu.core_type = #tpu.core_type<sc_scalar_subcore>, window_params = []} {
    return
  }
}

module attributes {stable_mosaic.version = 11 : i64} {
  func.func @kernel(%arg0: i32, %arg1: i32, %arg2: i32, %arg3: memref<128x128xf32, #tpu.memory_space<vmem>>, %arg4: memref<128x128xf32, #tpu.memory_space<vmem>>, %arg5: memref<2x128xf32, #tpu.memory_space<vmem>>, %arg6: memref<1x128x128xf32, #tpu.memory_space<vmem>>, %arg7: memref<1x3x128xf32, #tpu.memory_space<vmem>>, %arg8: memref<2x128xf32, #tpu.memory_space<vmem>>, %arg9: memref<1x1x128xf32, #tpu.memory_space<vmem>>, %arg10: memref<2x128x128xf32, #tpu.memory_space<vmem>>, %arg11: memref<128x128xf32, #tpu.memory_space<vmem>>) attributes {dimension_semantics = [#tpu.dimension_semantics<arbitrary>, #tpu.dimension_semantics<arbitrary>, #tpu.dimension_semantics<arbitrary>], iteration_bounds = array<i64: 3, 1, 1>, scalar_prefetch = 0 : i64, scratch_operands = 2 : i64, tpu.core_type = #tpu.core_type<tc>, window_params = [{transform_indices = @transform_0, window_bounds = array<i64: 128, 128>}, {pipeline_mode = #tpu.pipeline_mode<synchronous>, transform_indices = @transform_1, window_bounds = array<i64: 128, 128>}, {pipeline_mode = #tpu.pipeline_mode<synchronous>, transform_indices = @transform_2, window_bounds = array<i64: 2, 128>}, {transform_indices = @transform_3, window_bounds = array<i64: 1, 128, 128>}, {transform_indices = @transform_4, window_bounds = array<i64: 1, 3, 128>}, {pipeline_mode = #tpu.pipeline_mode<synchronous>, transform_indices = @transform_5, window_bounds = array<i64: 2, 128>}, {transform_indices = @transform_6, window_bounds = array<i64: 1, 1, 128>}]} {
    %c128_i32 = arith.constant 128 : i32
    %0 = arith.muli %arg1, %c128_i32 : i32
    %1 = tpu.assume_multiple %0, 128 : i32
    %c0_i32 = arith.constant 0 : i32
    %2 = arith.cmpi eq, %arg0, %c0_i32 : i32
    %c0_i32_0 = arith.constant 0 : i32
    %3 = arith.cmpi eq, %arg2, %c0_i32_0 : i32
    %4 = arith.andi %2, %3 : i1
    %5 = arith.extui %4 : i1 to i32
    %c0_i32_1 = arith.constant 0 : i32
    %6 = arith.cmpi ne, %5, %c0_i32_1 : i32
    scf.if %6 {
      %c0 = arith.constant 0 : index
      %c0_3 = arith.constant 0 : index
      %10 = vector.load %arg3[%c0, %c0_3] : memref<128x128xf32, #tpu.memory_space<vmem>>, vector<128x128xf32>
      %11 = arith.cmpf one, %10, %10 : vector<128x128xf32>
      %cst = arith.constant 0.000000e+00 : f32
      %12 = vector.broadcast %cst : f32 to vector<128x128xf32>
      %13 = arith.select %11, %12, %10 : vector<128x128xi1>, vector<128x128xf32>
      %cst_4 = arith.constant -1.000000e+06 : f32
      %cst_5 = arith.constant 1.000000e+06 : f32
      %14 = vector.broadcast %cst_4 : f32 to vector<128x128xf32>
      %15 = arith.maximumf %14, %13 : vector<128x128xf32>
      %16 = vector.broadcast %cst_5 : f32 to vector<128x128xf32>
      %17 = arith.minimumf %16, %15 : vector<128x128xf32>
      %c0_6 = arith.constant 0 : index
      %c0_7 = arith.constant 0 : index
      %18 = vector.load %arg5[%c0_6, %c0_7] : memref<2x128xf32, #tpu.memory_space<vmem>>, vector<1x128xf32>
      %19 = vector.broadcast %18 : vector<1x128xf32> to vector<128x128xf32>
      %20 = arith.mulf %17, %19 : vector<128x128xf32>
      %c1 = arith.constant 1 : index
      %c0_8 = arith.constant 0 : index
      %21 = vector.load %arg5[%c1, %c0_8] : memref<2x128xf32, #tpu.memory_space<vmem>>, vector<1x128xf32>
      %22 = vector.broadcast %21 : vector<1x128xf32> to vector<128x128xf32>
      %23 = arith.addf %20, %22 : vector<128x128xf32>
      %24 = arith.cmpf one, %23, %23 : vector<128x128xf32>
      %cst_9 = arith.constant 0.000000e+00 : f32
      %25 = vector.broadcast %cst_9 : f32 to vector<128x128xf32>
      %26 = arith.select %24, %25, %23 : vector<128x128xi1>, vector<128x128xf32>
      %cst_10 = arith.constant -1.000000e+01 : f32
      %cst_11 = arith.constant 1.000000e+01 : f32
      %27 = vector.broadcast %cst_10 : f32 to vector<128x128xf32>
      %28 = arith.maximumf %27, %26 : vector<128x128xf32>
      %29 = vector.broadcast %cst_11 : f32 to vector<128x128xf32>
      %30 = arith.minimumf %29, %28 : vector<128x128xf32>
      %c0_12 = arith.constant 0 : index
      %31 = arith.index_cast %1 : i32 to index
      %c0_13 = arith.constant 0 : index
      %32 = vector.load %arg10[%c0_12, %31, %c0_13] : memref<2x128x128xf32, #tpu.memory_space<vmem>>, vector<1x128x128xf32>
      %33 = vector.shape_cast %32 : vector<1x128x128xf32> to vector<128x128xf32>
      %34 = vector.shape_cast %30 : vector<128x128xf32> to vector<1x128x128xf32>
      tpu.vector_store %arg10[%c0_12, %31, %c0_13], %34 {strides = array<i32>} : memref<2x128x128xf32, #tpu.memory_space<vmem>>, vector<1x128x128xf32>,
    } else {
    }
    %c1_i32 = arith.constant 1 : i32
    %7 = arith.cmpi sge, %arg0, %c1_i32 : i32
    %8 = arith.extui %7 : i1 to i32
    %c0_i32_2 = arith.constant 0 : i32
    %9 = arith.cmpi ne, %8, %c0_i32_2 : i32
    scf.if %9 {
      %c0_i32_3 = arith.constant 0 : i32
      %10 = arith.cmpi eq, %arg2, %c0_i32_3 : i32
      %11 = arith.extui %10 : i1 to i32
      %c0_i32_4 = arith.constant 0 : i32
      %12 = arith.cmpi ne, %11, %c0_i32_4 : i32
      scf.if %12 {
        %cst_14 = arith.constant 0.000000e+00 : f32
        %31 = vector.broadcast %cst_14 : f32 to vector<128x128xf32>
        %c0_15 = arith.constant 0 : index
        %c0_16 = arith.constant 0 : index
        %32 = vector.load %arg11[%c0_15, %c0_16] : memref<128x128xf32, #tpu.memory_space<vmem>>, vector<128x128xf32>
        tpu.vector_store %arg11[%c0_15, %c0_16], %31 {strides = array<i32>} : memref<128x128xf32, #tpu.memory_space<vmem>>, vector<128x128xf32>,
      } else {
      }
      %c1_i32_5 = arith.constant 1 : i32
      %13 = arith.subi %arg0, %c1_i32_5 : i32
      %c1_i32_6 = arith.constant 1 : i32
      %14 = arith.andi %13, %c1_i32_6 : i32
      %c128_i32_7 = arith.constant 128 : i32
      %15 = arith.muli %arg2, %c128_i32_7 : i32
      %16 = tpu.assume_multiple %15, 128 : i32
      %17 = arith.index_cast %14 : i32 to index
      %18 = arith.index_cast %16 : i32 to index
      %c0 = arith.constant 0 : index
      %19 = vector.load %arg10[%17, %18, %c0] : memref<2x128x128xf32, #tpu.memory_space<vmem>>, vector<1x128x128xf32>
      %20 = vector.shape_cast %19 : vector<1x128x128xf32> to vector<128x128xf32>
      %21 = arith.index_cast %1 : i32 to index
      %22 = arith.index_cast %16 : i32 to index
      %23 = vector.load %arg4[%21, %22] : memref<128x128xf32, #tpu.memory_space<vmem>>, vector<128x128xf32>
      %c0_8 = arith.constant 0 : index
      %c0_9 = arith.constant 0 : index
      %24 = vector.load %arg11[%c0_8, %c0_9] : memref<128x128xf32, #tpu.memory_space<vmem>>, vector<128x128xf32>
      %cst = arith.constant dense<0.000000e+00> : vector<128x128xf32>
      %25 = tpu.matmul %23, %20, %cst {dimension_numbers = #tpu.dot_dimension_numbers<[1], [0], [0], [1], [0, 0, 1, 1], [], []>} : vector<128x128xf32>, vector<128x128xf32>, vector<128x128xf32> -> vector<128x128xf32>
      %26 = arith.addf %24, %25 : vector<128x128xf32>
      %c0_10 = arith.constant 0 : index
      %c0_11 = arith.constant 0 : index
      %27 = vector.load %arg11[%c0_10, %c0_11] : memref<128x128xf32, #tpu.memory_space<vmem>>, vector<128x128xf32>
      tpu.vector_store %arg11[%c0_10, %c0_11], %26 {strides = array<i32>} : memref<128x128xf32, #tpu.memory_space<vmem>>, vector<128x128xf32>,
      %c0_i32_12 = arith.constant 0 : i32
      %28 = arith.cmpi eq, %arg2, %c0_i32_12 : i32
      %29 = arith.extui %28 : i1 to i32
      %c0_i32_13 = arith.constant 0 : i32
      %30 = arith.cmpi ne, %29, %c0_i32_13 : i32
      scf.if %30 {
        %c1_i32_14 = arith.constant 1 : i32
        %31 = arith.andi %arg0, %c1_i32_14 : i32
        %c0_15 = arith.constant 0 : index
        %c0_16 = arith.constant 0 : index
        %32 = vector.load %arg11[%c0_15, %c0_16] : memref<128x128xf32, #tpu.memory_space<vmem>>, vector<128x128xf32>
        %c0_17 = arith.constant 0 : index
        %c0_18 = arith.constant 0 : index
        %c0_19 = arith.constant 0 : index
        %33 = vector.load %arg6[%c0_17, %c0_18, %c0_19] : memref<1x128x128xf32, #tpu.memory_space<vmem>>, vector<1x128x128xf32>
        %34 = vector.shape_cast %33 : vector<1x128x128xf32> to vector<128x128xf32>
        %cst_20 = arith.constant dense<0.000000e+00> : vector<128x128xf32>
        %35 = tpu.matmul %32, %34, %cst_20 {dimension_numbers = #tpu.dot_dimension_numbers<[1], [0], [0], [1], [0, 0, 1, 1], [], []>} : vector<128x128xf32>, vector<128x128xf32>, vector<128x128xf32> -> vector<128x128xf32>
        %c0_21 = arith.constant 0 : index
        %c0_22 = arith.constant 0 : index
        %c0_23 = arith.constant 0 : index
        %36 = vector.load %arg7[%c0_21, %c0_22, %c0_23] : memref<1x3x128xf32, #tpu.memory_space<vmem>>, vector<1x1x128xf32>
        %37 = vector.shape_cast %36 : vector<1x1x128xf32> to vector<1x128xf32>
        %38 = vector.broadcast %37 : vector<1x128xf32> to vector<128x128xf32>
        %39 = arith.addf %35, %38 : vector<128x128xf32>
        %40 = arith.cmpf one, %39, %39 : vector<128x128xf32>
        %cst_24 = arith.constant 0.000000e+00 : f32
        %41 = vector.broadcast %cst_24 : f32 to vector<128x128xf32>
        %42 = arith.select %40, %41, %39 : vector<128x128xi1>, vector<128x128xf32>
        %cst_25 = arith.constant -1.000000e+01 : f32
        %cst_26 = arith.constant 1.000000e+01 : f32
        %43 = vector.broadcast %cst_25 : f32 to vector<128x128xf32>
        %44 = arith.maximumf %43, %42 : vector<128x128xf32>
        %45 = vector.broadcast %cst_26 : f32 to vector<128x128xf32>
        %46 = arith.minimumf %45, %44 : vector<128x128xf32>
        %c0_27 = arith.constant 0 : index
        %c1 = arith.constant 1 : index
        %c0_28 = arith.constant 0 : index
        %47 = vector.load %arg7[%c0_27, %c1, %c0_28] : memref<1x3x128xf32, #tpu.memory_space<vmem>>, vector<1x1x128xf32>
        %48 = vector.shape_cast %47 : vector<1x1x128xf32> to vector<1x128xf32>
        %49 = vector.broadcast %48 : vector<1x128xf32> to vector<128x128xf32>
        %50 = arith.mulf %46, %49 : vector<128x128xf32>
        %c0_29 = arith.constant 0 : index
        %c2 = arith.constant 2 : index
        %c0_30 = arith.constant 0 : index
        %51 = vector.load %arg7[%c0_29, %c2, %c0_30] : memref<1x3x128xf32, #tpu.memory_space<vmem>>, vector<1x1x128xf32>
        %52 = vector.shape_cast %51 : vector<1x1x128xf32> to vector<1x128xf32>
        %53 = vector.broadcast %52 : vector<1x128xf32> to vector<128x128xf32>
        %54 = arith.addf %50, %53 : vector<128x128xf32>
        %cst_31 = arith.constant 0.000000e+00 : f32
        %cst_32 = arith.constant 1.000000e+01 : f32
        %55 = vector.broadcast %cst_31 : f32 to vector<128x128xf32>
        %56 = arith.maximumf %55, %54 : vector<128x128xf32>
        %57 = vector.broadcast %cst_32 : f32 to vector<128x128xf32>
        %58 = arith.minimumf %57, %56 : vector<128x128xf32>
        %59 = arith.index_cast %31 : i32 to index
        %60 = arith.index_cast %1 : i32 to index
        %c0_33 = arith.constant 0 : index
        %61 = vector.load %arg10[%59, %60, %c0_33] : memref<2x128x128xf32, #tpu.memory_space<vmem>>, vector<1x128x128xf32>
        %62 = vector.shape_cast %61 : vector<1x128x128xf32> to vector<128x128xf32>
        %63 = vector.shape_cast %58 : vector<128x128xf32> to vector<1x128x128xf32>
        tpu.vector_store %arg10[%59, %60, %c0_33], %63 {strides = array<i32>} : memref<2x128x128xf32, #tpu.memory_space<vmem>>, vector<1x128x128xf32>,
        %c2_i32 = arith.constant 2 : i32
        %64 = arith.cmpi eq, %arg0, %c2_i32 : i32
        %65 = arith.extui %64 : i1 to i32
        %c0_i32_34 = arith.constant 0 : i32
        %66 = arith.cmpi ne, %65, %c0_i32_34 : i32
        scf.if %66 {
          %c0_35 = arith.constant 0 : index
          %c0_36 = arith.constant 0 : index
          %67 = vector.load %arg8[%c0_35, %c0_36] : memref<2x128xf32, #tpu.memory_space<vmem>>, vector<1x128xf32>
          %cst_37 = arith.constant dense<0.000000e+00> : vector<1x128xf32>
          %68 = tpu.matmul %67, %58, %cst_37 {dimension_numbers = #tpu.dot_dimension_numbers<[1], [1], [0], [0], [0, 0, 1, 0], [], []>} : vector<1x128xf32>, vector<128x128xf32>, vector<1x128xf32> -> vector<1x128xf32>
          %c1_38 = arith.constant 1 : index
          %c0_39 = arith.constant 0 : index
          %69 = vector.load %arg8[%c1_38, %c0_39] : memref<2x128xf32, #tpu.memory_space<vmem>>, vector<1x1xf32>
          %70 = vector.broadcast %69 : vector<1x1xf32> to vector<1x128xf32>
          %71 = arith.addf %68, %70 : vector<1x128xf32>
          %72 = arith.cmpf one, %71, %71 : vector<1x128xf32>
          %cst_40 = arith.constant 0.000000e+00 : f32
          %73 = vector.broadcast %cst_40 : f32 to vector<1x128xf32>
          %74 = arith.select %72, %73, %71 : vector<1x128xi1>, vector<1x128xf32>
          %cst_41 = arith.constant -1.000000e+01 : f32
          %cst_42 = arith.constant 1.000000e+01 : f32
          %75 = vector.broadcast %cst_41 : f32 to vector<1x128xf32>
          %76 = arith.maximumf %75, %74 : vector<1x128xf32>
          %77 = vector.broadcast %cst_42 : f32 to vector<1x128xf32>
          %78 = arith.minimumf %77, %76 : vector<1x128xf32>
          %79 = vector.shape_cast %78 : vector<1x128xf32> to vector<1x1x128xf32>
          %c0_43 = arith.constant 0 : index
          %c0_44 = arith.constant 0 : index
          %c0_45 = arith.constant 0 : index
          %80 = vector.load %arg9[%c0_43, %c0_44, %c0_45] : memref<1x1x128xf32, #tpu.memory_space<vmem>>, vector<1x1x128xf32>
          tpu.vector_store %arg9[%c0_43, %c0_44, %c0_45], %79 {strides = array<i32>} : memref<1x1x128xf32, #tpu.memory_space<vmem>>, vector<1x1x128xf32>,
        } else {
        }
      } else {
      }
    } else {
    }
    return
  }
  func.func @transform_0(%arg0: i32, %arg1: i32, %arg2: i32) -> (i32, i32) {
    %c0_i32 = arith.constant 0 : i32
    %0 = arith.cmpi eq, %arg0, %c0_i32 : i32
    %c0_i32_0 = arith.constant 0 : i32
    %1 = arith.select %0, %arg1, %c0_i32_0 : i32
    %c0_i32_1 = arith.constant 0 : i32
    %c0_i32_2 = arith.constant 0 : i32
    return %1, %c0_i32_1 : i32, i32
  }
  func.func @transform_1(%arg0: i32, %arg1: i32, %arg2: i32) -> (i32, i32) {
    %c0_i32 = arith.constant 0 : i32
    %c0_i32_0 = arith.constant 0 : i32
    %c0_i32_1 = arith.constant 0 : i32
    return %c0_i32, %c0_i32_0 : i32, i32
  }
  func.func @transform_2(%arg0: i32, %arg1: i32, %arg2: i32) -> (i32, i32) {
    %c0_i32 = arith.constant 0 : i32
    %c0_i32_0 = arith.constant 0 : i32
    %c0_i32_1 = arith.constant 0 : i32
    return %c0_i32, %c0_i32_0 : i32, i32
  }
  func.func @transform_3(%arg0: i32, %arg1: i32, %arg2: i32) -> (i32, i32, i32) {
    %c1_i32 = arith.constant 1 : i32
    %0 = arith.subi %arg0, %c1_i32 : i32
    %c0_i32 = arith.constant 0 : i32
    %1 = arith.maxsi %0, %c0_i32 : i32
    %c0_i32_0 = arith.constant 0 : i32
    %c0_i32_1 = arith.constant 0 : i32
    %c0_i32_2 = arith.constant 0 : i32
    return %1, %c0_i32_0, %c0_i32_1 : i32, i32, i32
  }
  func.func @transform_4(%arg0: i32, %arg1: i32, %arg2: i32) -> (i32, i32, i32) {
    %c1_i32 = arith.constant 1 : i32
    %0 = arith.subi %arg0, %c1_i32 : i32
    %c0_i32 = arith.constant 0 : i32
    %1 = arith.maxsi %0, %c0_i32 : i32
    %c0_i32_0 = arith.constant 0 : i32
    %c0_i32_1 = arith.constant 0 : i32
    %c0_i32_2 = arith.constant 0 : i32
    return %1, %c0_i32_0, %c0_i32_1 : i32, i32, i32
  }
  func.func @transform_5(%arg0: i32, %arg1: i32, %arg2: i32) -> (i32, i32) {
    %c0_i32 = arith.constant 0 : i32
    %c0_i32_0 = arith.constant 0 : i32
    %c0_i32_1 = arith.constant 0 : i32
    return %c0_i32, %c0_i32_0 : i32, i32
  }
  func.func @transform_6(%arg0: i32, %arg1: i32, %arg2: i32) -> (i32, i32, i32) {
    %c2_i32 = arith.constant 2 : i32
    %0 = arith.cmpi eq, %arg0, %c2_i32 : i32
    %c0_i32 = arith.constant 0 : i32
    %1 = arith.select %0, %arg1, %c0_i32 : i32
    %c0_i32_0 = arith.constant 0 : i32
    %c0_i32_1 = arith.constant 0 : i32
    %c0_i32_2 = arith.constant 0 : i32
    return %1, %c0_i32_0, %c0_i32_1 : i32, i32, i32
  }
}

</mosaic_0001>

<bundles_post_ra>
// kernel: spatio_temporal_gcn_forward.1
= control target key start
LH: loop header
LB: loop body
LE: loop exit
PB: predicated region body
PF: predicated region fallthrough
CT: control target
= control target key end

     0   :  { %s1784_s21 = smov 0   ;;  %s1786_s22 = smov 0   ;;  %s2122_s0 = inlined_call_operand.vmem [shape: f32[128,128], index: 0, kind: input, shape index: {}]   ;;  %s2123_s1 = inlined_call_operand.vmem [shape: f32[128,128], index: 1, kind: input, shape index: {}]   ;;  %s2124_s2 = inlined_call_operand.vmem [shape: f32[2,128], index: 2, kind: input, shape index: {}]   ;;  %s2125_s3 = inlined_call_operand.vmem [shape: f32[2,128,128], index: 3, kind: input, shape index: {}]   ;;  %s2126_s4 = inlined_call_operand.vmem [shape: f32[2,3,128], index: 4, kind: input, shape index: {}]   ;;  %s2127_s5 = inlined_call_operand.vmem [shape: f32[2,128], index: 5, kind: input, shape index: {}]   ;;  %s2128_s6 = inlined_call_operand.vmem [shape: f32[1,1,128], index: 6, kind: output, shape index: {}]  }
   0x1   :  { %s1788_s23 = smov 0  }
   0x2 LB: > { %s35_s24 = sadd.s32 1, %s1740_s22  ;;  %p1380_p0 = scmp.ge.s32.totalorder %s1744_s23, 1  ;;  %s1744_s23 = sphi %s1788_s23, %s16_s23   ;;  %s1740_s22 = sphi %s1786_s22, %s2130_s22   ;;  %s1736_s21 = sphi %s1784_s21, %s2129_s21  }
   0x3   : > { %p37_p1 = scmp.ge.s32.totalorder %s35_s24, 3  ;;  %p287_p2 = scmp.lt.s32.totalorder %s1744_s23, 4 }
   0x5   : > { %s2132_s24 = smov (%p37_p1, %s35_s24), 0  ;;  %p288_p3 = pnand %p1380_p0, %p287_p2 }
   0x6   : > { %s1805_s25 = sadd.s32 (!%p288_p3), 4294967295, %s1736_s21  ;;  %p373_p4 = scmp.eq.s32.totalorder (!%p288_p3), %s1736_s21, 0 }
   0x7   : > { %291 = sbr.rel (%p288_p3) target bundleno = 792 (0x318), region = 44  ;;  %p345_p5 = scmp.gt.s32.totalorder (!%p288_p3), %s1805_s25, 0 }
   0x8   : > { %p1382_p6 = scmp.lt.s32.totalorder (!%p288_p3), %s1805_s25, 1 }
   0xc   : > { %s346_s26 = scalar_select %p345_p5, %s1805_s25, 0  ;;  %v379_v0 = vld [vmem:[%s2122_s0] sm:$0xff] (%p373_p4)  ;;  %v380_v2 = vld [vmem:[%s2122_s0 + $0x8] sm:$0xff] (%p373_p4)  ;;  %v381_v3 = vld [vmem:[%s2122_s0 + $0x10] sm:$0xff] (%p373_p4) }
   0xd   : > { %378 = sbr.rel (!%p373_p4) target bundleno = 51 (0x33), region = 48  ;;  %v1827_v1 = vld [vmem:[%s2124_s2] ss:$0 sm:$0xff] (%p373_p4)  ;;  %vm395_vm0 = vcmp.ne.f32.partialorder (%p373_p4), %v379_v0, %v379_v0  ;;  %v382_v4 = vld [vmem:[%s2122_s0 + $0x18] sm:$0xff] (%p373_p4)  ;;  %v1841_v6 = vld [vmem:[%s2124_s2 + $0x1] ss:$0 sm:$0xff] (%p373_p4)  ;;  %vm396_vm1 = vcmp.ne.f32.partialorder (%p373_p4), %v380_v2, %v380_v2  ;;  %vm397_vm2 = vcmp.ne.f32.partialorder (%p373_p4), %v381_v3, %v381_v3 }
   0xe   : > { %s2134_s26 = smov (!%p1382_p6, %s346_s26), 1  ;;  %v411_v5 = vsel (%p373_p4), %vm395_vm0, 0.0, %v379_v0  ;;  %vm398_vm3 = vcmp.ne.f32.partialorder (%p373_p4), %v382_v4, %v382_v4  ;;  %v383_v7 = vld [vmem:[%s2122_s0 + $0x20] sm:$0xff] (%p373_p4)  ;;  %v384_v8 = vld [vmem:[%s2122_s0 + $0x28] sm:$0xff] (%p373_p4)  ;;  %v385_v9 = vld [vmem:[%s2122_s0 + $0x30] sm:$0xff] (%p373_p4)  ;;  %v412_v11 = vsel (%p373_p4), %vm396_vm1, 0.0, %v380_v2 }
   0xf   : > { %s1462_s27 = sshll.u32 %s2134_s26, 7  ;;  %s1395_s28 = sshll.u32 %s2134_s26, 2  ;;  %v1397_v10 = vclamps-f32 (%p373_p4), %v411_v5, 1000000.0  ;;  %v413_v12 = vsel (%p373_p4), %vm397_vm2, 0.0, %v381_v3  ;;  %v414_v13 = vsel (%p373_p4), %vm398_vm3, 0.0, %v382_v4  ;;  %vm399_vm4 = vcmp.ne.f32.partialorder (%p373_p4), %v383_v7, %v383_v7 }
  0x10   : > { %s1814_s7 = scalar_lea.vmem %s2125_s3, %s1462_s27  ;;  %s1819_s10 = scalar_lea.vmem %s2126_s4, %s1395_s28  ;;  %v386_v14 = vld [vmem:[%s2122_s0 + $0x38] sm:$0xff] (%p373_p4)  ;;  %v1398_v15 = vclamps-f32 (%p373_p4), %v412_v11, 1000000.0  ;;  %v1399_v16 = vclamps-f32 (%p373_p4), %v413_v12, 1000000.0  ;;  %v415_v19 = vsel (%p373_p4), %vm399_vm4, 0.0, %v383_v7  ;;  %vm400_vm5 = vcmp.ne.f32.partialorder (%p373_p4), %v384_v8, %v384_v8 }
  0x11   : > { %v1400_v17 = vclamps-f32 (%p373_p4), %v414_v13, 1000000.0  ;;  %v464_v18 = vmul.f32 (%p373_p4), %v1827_v1, %v1397_v10  ;;  %vm401_vm6 = vcmp.ne.f32.partialorder (%p373_p4), %v385_v9, %v385_v9  ;;  %v1401_v23 = vclamps-f32 (%p373_p4), %v415_v19, 1000000.0  ;;  %v387_v35 = vld [vmem:[%s2122_s0 + $0x40] sm:$0xff] (%p373_p4)  ;;  %v388_v40 = vld [vmem:[%s2122_s0 + $0x48] sm:$0xff] (%p373_p4) }
  0x12   : > { %v465_v20 = vmul.f32 %v1827_v1, %v1398_v15  ;;  %v466_v21 = vmul.f32 %v1827_v1, %v1399_v16  ;;  %v416_v25 = vsel %vm400_vm5, 0.0, %v384_v8  ;;  %v417_v26 = vsel %vm401_vm6, 0.0, %v385_v9  ;;  %v389_v41 = vld [vmem:[%s2122_s0 + $0x50] sm:$0xff]  ;;  %v390_v60 = vld [vmem:[%s2122_s0 + $0x58] sm:$0xff]  ;;  %v391_v2 = vld [vmem:[%s2122_s0 + $0x60] sm:$0xff] }
  0x13   : > { %v467_v22 = vmul.f32 %v1827_v1, %v1400_v17  ;;  %v485_v24 = vadd.f32 %v1841_v6, %v464_v18  ;;  %vm402_vm7 = vcmp.ne.f32.partialorder %v386_v14, %v386_v14  ;;  %v468_v30 = vmul.f32 %v1827_v1, %v1401_v23  ;;  %v392_v10 = vld [vmem:[%s2122_s0 + $0x68] sm:$0xff]  ;;  %v393_v19 = vld [vmem:[%s2122_s0 + $0x70] sm:$0xff]  ;;  %v394_v23 = vld [vmem:[%s2122_s0 + $0x78] sm:$0xff] }
  0x14   : > { %v486_v27 = vadd.f32 %v1841_v6, %v465_v20  ;;  %v487_v28 = vadd.f32 %v1841_v6, %v466_v21  ;;  %v1402_v31 = vclamps-f32 %v416_v25, 1000000.0  ;;  %v1403_v32 = vclamps-f32 %v417_v26, 1000000.0 }
  0x15   : > { %v488_v29 = vadd.f32 %v1841_v6, %v467_v22  ;;  %vm501_vm8 = vcmp.ne.f32.partialorder %v485_v24, %v485_v24  ;;  %v418_v33 = vsel %vm402_vm7, 0.0, %v386_v14  ;;  %v489_v45 = vadd.f32 %v1841_v6, %v468_v30 }
  0x16   : > { %v517_v34 = vsel %vm501_vm8, 0.0, %v485_v24  ;;  %vm502_vm9 = vcmp.ne.f32.partialorder %v486_v27, %v486_v27  ;;  %vm503_vm10 = vcmp.ne.f32.partialorder %v487_v28, %v487_v28  ;;  %v469_v46 = vmul.f32 %v1827_v1, %v1402_v31 }
  0x17   : > { %vm504_vm11 = vcmp.ne.f32.partialorder %v488_v29, %v488_v29  ;;  %v1415_v36 = vclamps-f32 %v517_v34, 10.0  ;;  %v518_v37 = vsel %vm502_vm9, 0.0, %v486_v27  ;;  %v519_v38 = vsel %vm503_vm10, 0.0, %v487_v28 }
  0x18   : > { %v520_v39 = vsel %vm504_vm11, 0.0, %v488_v29  ;;  %v1416_v42 = vclamps-f32 %v518_v37, 10.0  ;;  %v1417_v43 = vclamps-f32 %v519_v38, 10.0  ;;  %v470_v47 = vmul.f32 %v1827_v1, %v1403_v32 }
  0x19   : > { %v1418_v44 = vclamps-f32 %v520_v39, 10.0  ;;  %566 = vst [vmem:[#allocation2] sm:$0xff] %v1415_v36  ;;  %v1404_v48 = vclamps-f32 %v418_v33, 1000000.0  ;;  %vm403_vm12 = vcmp.ne.f32.partialorder %v387_v35, %v387_v35  ;;  %vm505_vm13 = vcmp.ne.f32.partialorder %v489_v45, %v489_v45 }
  0x1a   : > { %567 = vst [vmem:[#allocation2 + $0x8] sm:$0xff] %v1416_v42  ;;  %568 = vst [vmem:[#allocation2 + $0x10] sm:$0xff] %v1417_v43  ;;  %v419_v49 = vsel %vm403_vm12, 0.0, %v387_v35  ;;  %vm404_vm14 = vcmp.ne.f32.partialorder %v388_v40, %v388_v40  ;;  %vm405_vm15 = vcmp.ne.f32.partialorder %v389_v41, %v389_v41  ;;  %v521_v50 = vsel %vm505_vm13, 0.0, %v489_v45 }
  0x1b   : > { %569 = vst [vmem:[#allocation2 + $0x18] sm:$0xff] %v1418_v44  ;;  %v490_v51 = vadd.f32 %v1841_v6, %v469_v46  ;;  %v491_v52 = vadd.f32 %v1841_v6, %v470_v47  ;;  %v471_v53 = vmul.f32 %v1827_v1, %v1404_v48  ;;  %v1419_v54 = vclamps-f32 %v521_v50, 10.0 }
  0x1c   : > { %v1405_v55 = vclamps-f32 %v419_v49, 1000000.0  ;;  %v420_v56 = vsel %vm404_vm14, 0.0, %v388_v40  ;;  %v421_v57 = vsel %vm405_vm15, 0.0, %v389_v41  ;;  %vm406_vm3 = vcmp.ne.f32.partialorder %v390_v60, %v390_v60 }
  0x1d   : > { %vm506_vm0 = vcmp.ne.f32.partialorder %v490_v51, %v490_v51  ;;  %vm507_vm1 = vcmp.ne.f32.partialorder %v491_v52, %v491_v52  ;;  %v492_v58 = vadd.f32 %v1841_v6, %v471_v53  ;;  %v1406_v59 = vclamps-f32 %v420_v56, 1000000.0  ;;  %570 = vst [vmem:[#allocation2 + $0x20] sm:$0xff] %v1419_v54 }
  0x1e   : > { %v522_v61 = vsel %vm506_vm0, 0.0, %v490_v51  ;;  %v523_v62 = vsel %vm507_vm1, 0.0, %v491_v52  ;;  %v472_v63 = vmul.f32 %v1827_v1, %v1405_v55  ;;  %v1407_v0 = vclamps-f32 %v421_v57, 1000000.0 }
  0x1f   : > { %v1420_v3 = vclamps-f32 %v522_v61, 10.0  ;;  %v1421_v4 = vclamps-f32 %v523_v62, 10.0  ;;  %vm508_vm2 = vcmp.ne.f32.partialorder %v492_v58, %v492_v58  ;;  %v473_v5 = vmul.f32 %v1827_v1, %v1406_v59 }
  0x20   : > { %v524_v7 = vsel %vm508_vm2, 0.0, %v492_v58  ;;  %v493_v8 = vadd.f32 %v1841_v6, %v472_v63  ;;  %v474_v9 = vmul.f32 %v1827_v1, %v1407_v0  ;;  %v422_v13 = vsel %vm406_vm3, 0.0, %v390_v60 }
  0x21   : > { %571 = vst [vmem:[#allocation2 + $0x28] sm:$0xff] %v1420_v3  ;;  %572 = vst [vmem:[#allocation2 + $0x30] sm:$0xff] %v1421_v4  ;;  %v1422_v11 = vclamps-f32 %v524_v7, 10.0  ;;  %v494_v12 = vadd.f32 %v1841_v6, %v473_v5  ;;  %vm407_vm4 = vcmp.ne.f32.partialorder %v391_v2, %v391_v2  ;;  %v1408_v15 = vclamps-f32 %v422_v13, 1000000.0 }
  0x22   : > { %vm509_vm5 = vcmp.ne.f32.partialorder %v493_v8, %v493_v8  ;;  %v495_v14 = vadd.f32 %v1841_v6, %v474_v9  ;;  %v423_v16 = vsel %vm407_vm4, 0.0, %v391_v2  ;;  %vm408_vm7 = vcmp.ne.f32.partialorder %v392_v10, %v392_v10 }
  0x23   : > { %573 = vst [vmem:[#allocation2 + $0x38] sm:$0xff] %v1422_v11  ;;  %v525_v17 = vsel %vm509_vm5, 0.0, %v493_v8  ;;  %vm510_vm6 = vcmp.ne.f32.partialorder %v494_v12, %v494_v12  ;;  %v1409_v18 = vclamps-f32 %v423_v16, 1000000.0  ;;  %v475_v22 = vmul.f32 %v1827_v1, %v1408_v15 }
  0x24   : > { %v1423_v20 = vclamps-f32 %v525_v17, 10.0  ;;  %v526_v21 = vsel %vm510_vm6, 0.0, %v494_v12  ;;  %vm511_vm8 = vcmp.ne.f32.partialorder %v495_v14, %v495_v14  ;;  %v424_v27 = vsel %vm408_vm7, 0.0, %v392_v10 }
  0x25   : > { %v1424_v24 = vclamps-f32 %v526_v21, 10.0  ;;  %v527_v25 = vsel %vm511_vm8, 0.0, %v495_v14  ;;  %v476_v26 = vmul.f32 %v1827_v1, %v1409_v18  ;;  %v496_v29 = vadd.f32 %v1841_v6, %v475_v22 }
  0x26   : > { %574 = vst [vmem:[#allocation2 + $0x40] sm:$0xff] %v1423_v20  ;;  %v1425_v28 = vclamps-f32 %v527_v25, 10.0  ;;  %v1410_v30 = vclamps-f32 %v424_v27, 1000000.0  ;;  %vm409_vm9 = vcmp.ne.f32.partialorder %v393_v19, %v393_v19  ;;  %vm410_vm10 = vcmp.ne.f32.partialorder %v394_v23, %v394_v23 }
  0x27   : > { %575 = vst [vmem:[#allocation2 + $0x48] sm:$0xff] %v1424_v24  ;;  %v497_v31 = vadd.f32 %v1841_v6, %v476_v26  ;;  %v425_v32 = vsel %vm409_vm9, 0.0, %v393_v19  ;;  %vm512_vm11 = vcmp.ne.f32.partialorder %v496_v29, %v496_v29  ;;  %v426_v35 = vsel %vm410_vm10, 0.0, %v394_v23 }
  0x28   : > { %576 = vst [vmem:[#allocation2 + $0x50] sm:$0xff] %v1425_v28  ;;  %v477_v33 = vmul.f32 %v1827_v1, %v1410_v30  ;;  %v1411_v34 = vclamps-f32 %v425_v32, 1000000.0  ;;  %v528_v36 = vsel %vm512_vm11, 0.0, %v496_v29  ;;  %v1412_v37 = vclamps-f32 %v426_v35, 1000000.0 }
  0x29   : > { %vm513_vm12 = vcmp.ne.f32.partialorder %v497_v31, %v497_v31  ;;  %v1426_v38 = vclamps-f32 %v528_v36, 10.0 }
  0x2a   : > { %v529_v39 = vsel %vm513_vm12, 0.0, %v497_v31  ;;  %v498_v40 = vadd.f32 %v1841_v6, %v477_v33  ;;  %v478_v41 = vmul.f32 %v1827_v1, %v1411_v34  ;;  %v479_v43 = vmul.f32 %v1827_v1, %v1412_v37 }
  0x2b   : > { %v1427_v42 = vclamps-f32 %v529_v39, 10.0  ;;  %577 = vst [vmem:[#allocation2 + $0x58] sm:$0xff] %v1426_v38 }
  0x2c   : > { %vm514_vm13 = vcmp.ne.f32.partialorder %v498_v40, %v498_v40  ;;  %v499_v44 = vadd.f32 %v1841_v6, %v478_v41  ;;  %v500_v46 = vadd.f32 %v1841_v6, %v479_v43 }
  0x2d   : > { %578 = vst [vmem:[#allocation2 + $0x60] sm:$0xff] %v1427_v42  ;;  %v530_v45 = vsel %vm514_vm13, 0.0, %v498_v40 }
  0x2e   : > { %v1428_v47 = vclamps-f32 %v530_v45, 10.0  ;;  %vm515_vm14 = vcmp.ne.f32.partialorder %v499_v44, %v499_v44  ;;  %vm516_vm15 = vcmp.ne.f32.partialorder %v500_v46, %v500_v46 }
  0x2f   : > { %v531_v48 = vsel %vm515_vm14, 0.0, %v499_v44  ;;  %v532_v50 = vsel %vm516_vm15, 0.0, %v500_v46 }
  0x30   : > { %579 = vst [vmem:[#allocation2 + $0x68] sm:$0xff] %v1428_v47  ;;  %v1429_v49 = vclamps-f32 %v531_v48, 10.0  ;;  %v1430_v51 = vclamps-f32 %v532_v50, 10.0 }
  0x32   : > { %580 = vst [vmem:[#allocation2 + $0x70] sm:$0xff] %v1429_v49  ;;  %581 = vst [vmem:[#allocation2 + $0x78] sm:$0xff] %v1430_v51 }
  0x33 PF: > { %p1431_p7 = scmp.lt.s32.totalorder %s1736_s21, 1 }
  0x34   : > { %s606_s13 = sand.u32 (!%p1431_p7), 1, %s1805_s25  ;;  %p1454_p8 = scmp.ne.s32.totalorder (!%p1431_p7), %s1736_s21, 2 }
  0x35   : > { %585 = sbr.rel (%p1431_p7) target bundleno = 792 (0x318), region = 52  ;;  %s1433_s16 = sshll.u32 (!%p1431_p7), %s606_s13, 7 }
  0x36   : > { %s1916_s17 = scalar_lea.vmem (!%p1431_p7), [#allocation2], %s1433_s16 }
  0x3a   : > { %v631_v1 = vld [vmem:[%s2123_s1] sm:$0xff]  ;;  %v626_v6 = vld [vmem:[%s1916_s17 + $0x78] sm:$0xff]  ;;  %v625_v52 = vld [vmem:[%s1916_s17 + $0x70] sm:$0xff] }
  0x3b   : > { %1579 = vmatprep.mubr.f32.mxu0 %v631_v1  ;;  %1547 = vmatprep.subr.mxu0 %v626_v6  ;;  %v624_v53 = vld [vmem:[%s1916_s17 + $0x68] sm:$0xff]  ;;  %v623_v54 = vld [vmem:[%s1916_s17 + $0x60] sm:$0xff]  ;;  %v622_v55 = vld [vmem:[%s1916_s17 + $0x58] sm:$0xff] }
  0x3c   : > { %1548 = vmatpush3.msra.mxu0 %v626_v6  ;;  %v875_v56 = vld [vmem:[%s1814_s7 + $0x78] sm:$0xff]  ;;  %v621_v57 = vld [vmem:[%s1916_s17 + $0x50] sm:$0xff]  ;;  %v873_v59 = vld [vmem:[%s1814_s7 + $0x68] sm:$0xff] }
  0x3d   : > { %1549 = vmatprep.subr.mxu0 %v625_v52  ;;  %1603 = vmatprep.subr.mxu1 %v875_v56  ;;  %v874_v58 = vld [vmem:[%s1814_s7 + $0x70] sm:$0xff]  ;;  %v620_v60 = vld [vmem:[%s1916_s17 + $0x48] sm:$0xff]  ;;  %v872_v61 = vld [vmem:[%s1814_s7 + $0x60] sm:$0xff] }
  0x3e   : > { %1550 = vmatpush3.msra.mxu0 %v625_v52  ;;  %1604 = vmatpush3.msra.mxu1 %v875_v56  ;;  %v619_v62 = vld [vmem:[%s1916_s17 + $0x40] sm:$0xff]  ;;  %v871_v63 = vld [vmem:[%s1814_s7 + $0x58] sm:$0xff]  ;;  %v870_v2 = vld [vmem:[%s1814_s7 + $0x50] sm:$0xff] }
  0x3f   : > { %1551 = vmatprep.subr.mxu0 %v624_v53  ;;  %1605 = vmatprep.subr.mxu1 %v874_v58  ;;  %v618_v0 = vld [vmem:[%s1916_s17 + $0x38] sm:$0xff]  ;;  %v617_v3 = vld [vmem:[%s1916_s17 + $0x30] sm:$0xff]  ;;  %v869_v4 = vld [vmem:[%s1814_s7 + $0x48] sm:$0xff] }
  0x40   : > { %1552 = vmatpush3.msra.mxu0 %v624_v53  ;;  %1606 = vmatpush3.msra.mxu1 %v874_v58  ;;  %v616_v5 = vld [vmem:[%s1916_s17 + $0x28] sm:$0xff]  ;;  %v868_v7 = vld [vmem:[%s1814_s7 + $0x40] sm:$0xff]  ;;  %v867_v9 = vld [vmem:[%s1814_s7 + $0x38] sm:$0xff] }
  0x41   : > { %1553 = vmatprep.subr.mxu0 %v623_v54  ;;  %1607 = vmatprep.subr.mxu1 %v873_v59  ;;  %v615_v8 = vld [vmem:[%s1916_s17 + $0x20] sm:$0xff]  ;;  %v614_v10 = vld [vmem:[%s1916_s17 + $0x18] sm:$0xff]  ;;  %v866_v11 = vld [vmem:[%s1814_s7 + $0x30] sm:$0xff] }
  0x42   : > { %1554 = vmatpush3.msra.mxu0 %v623_v54  ;;  %1608 = vmatpush3.msra.mxu1 %v873_v59  ;;  %v613_v12 = vld [vmem:[%s1916_s17 + $0x10] sm:$0xff]  ;;  %v865_v13 = vld [vmem:[%s1814_s7 + $0x28] sm:$0xff]  ;;  %v864_v15 = vld [vmem:[%s1814_s7 + $0x20] sm:$0xff] }
  0x43   : > { %1555 = vmatprep.subr.mxu0 %v622_v55  ;;  %1609 = vmatprep.subr.mxu1 %v872_v61  ;;  %v612_v14 = vld [vmem:[%s1916_s17 + $0x8] sm:$0xff]  ;;  %v611_v16 = vld [vmem:[%s1916_s17] sm:$0xff]  ;;  %v863_v17 = vld [vmem:[%s1814_s7 + $0x18] sm:$0xff] }
  0x44   : > { %1556 = vmatpush3.msra.mxu0 %v622_v55  ;;  %1610 = vmatpush3.msra.mxu1 %v872_v61  ;;  %v632_v18 = vld [vmem:[%s2123_s1 + $0x8] sm:$0xff]  ;;  %v633_v19 = vld [vmem:[%s2123_s1 + $0x10] sm:$0xff]  ;;  %v634_v21 = vld [vmem:[%s2123_s1 + $0x18] sm:$0xff] }
  0x45   : > { %1557 = vmatprep.subr.mxu0 %v621_v57  ;;  %1611 = vmatprep.subr.mxu1 %v871_v63  ;;  %v862_v20 = vld [vmem:[%s1814_s7 + $0x10] sm:$0xff]  ;;  %v635_v22 = vld [vmem:[%s2123_s1 + $0x20] sm:$0xff]  ;;  %v636_v23 = vld [vmem:[%s2123_s1 + $0x28] sm:$0xff] }
  0x46   : > { %1558 = vmatpush3.msra.mxu0 %v621_v57  ;;  %1612 = vmatpush3.msra.mxu1 %v871_v63  ;;  %v637_v24 = vld [vmem:[%s2123_s1 + $0x30] sm:$0xff]  ;;  %v638_v25 = vld [vmem:[%s2123_s1 + $0x38] sm:$0xff]  ;;  %v639_v26 = vld [vmem:[%s2123_s1 + $0x40] sm:$0xff] }
  0x47   : > { %1559 = vmatprep.subr.mxu0 %v620_v60  ;;  %1613 = vmatprep.subr.mxu1 %v870_v2  ;;  %v640_v27 = vld [vmem:[%s2123_s1 + $0x48] sm:$0xff]  ;;  %v641_v28 = vld [vmem:[%s2123_s1 + $0x50] sm:$0xff]  ;;  %v642_v29 = vld [vmem:[%s2123_s1 + $0x58] sm:$0xff] }
  0x48   : > { %1560 = vmatpush3.msra.mxu0 %v620_v60  ;;  %1614 = vmatpush3.msra.mxu1 %v870_v2  ;;  %v643_v30 = vld [vmem:[%s2123_s1 + $0x60] sm:$0xff]  ;;  %v644_v31 = vld [vmem:[%s2123_s1 + $0x68] sm:$0xff]  ;;  %v645_v32 = vld [vmem:[%s2123_s1 + $0x70] sm:$0xff] }
  0x49   : > { %1561 = vmatprep.subr.mxu0 %v619_v62  ;;  %1615 = vmatprep.subr.mxu1 %v869_v4  ;;  %v646_v33 = vld [vmem:[%s2123_s1 + $0x78] sm:$0xff]  ;;  %v861_v34 = vld [vmem:[%s1814_s7 + $0x8] sm:$0xff]  ;;  %v860_v35 = vld [vmem:[%s1814_s7] sm:$0xff]  ;;  %s843_s7 = sand.u32 1, %s1736_s21 }
  0x4a   : > { %1562 = vmatpush3.msra.mxu0 %v619_v62  ;;  %1616 = vmatpush3.msra.mxu1 %v869_v4  ;;  %v1996_v1 = vld [vmem:[%s1819_s10] ss:$0 sm:$0xff]  ;;  %v2001_v56 = vld [vmem:[%s1819_s10 + $0x1] ss:$0 sm:$0xff]  ;;  %v2006_v60 = vld [vmem:[%s1819_s10 + $0x2] ss:$0 sm:$0xff] }
  0x4b   : > { %1563 = vmatprep.subr.mxu0 %v618_v0  ;;  %1617 = vmatprep.subr.mxu1 %v868_v7  ;;  %s1453_s12 = sshll.u32 %s843_s7, 7 }
  0x4c   : > { %1564 = vmatpush3.msra.mxu0 %v618_v0  ;;  %1618 = vmatpush3.msra.mxu1 %v868_v7  ;;  %s2021_s10 = scalar_lea.vmem [#allocation2], %s1453_s12 }
  0x4d   : > { %1565 = vmatprep.subr.mxu0 %v617_v3  ;;  %1619 = vmatprep.subr.mxu1 %v867_v9 }
  0x4e   : > { %1566 = vmatpush3.msra.mxu0 %v617_v3  ;;  %1620 = vmatpush3.msra.mxu1 %v867_v9 }
  0x4f   : > { %1567 = vmatprep.subr.mxu0 %v616_v5  ;;  %1621 = vmatprep.subr.mxu1 %v866_v11 }
  0x50   : > { %1568 = vmatpush3.msra.mxu0 %v616_v5  ;;  %1622 = vmatpush3.msra.mxu1 %v866_v11 }
  0x51   : > { %1569 = vmatprep.subr.mxu0 %v615_v8  ;;  %1623 = vmatprep.subr.mxu1 %v865_v13 }
  0x52   : > { %1570 = vmatpush3.msra.mxu0 %v615_v8  ;;  %1624 = vmatpush3.msra.mxu1 %v865_v13 }
  0x53   : > { %1571 = vmatprep.subr.mxu0 %v614_v10  ;;  %1625 = vmatprep.subr.mxu1 %v864_v15 }
  0x54   : > { %1572 = vmatpush3.msra.mxu0 %v614_v10  ;;  %1626 = vmatpush3.msra.mxu1 %v864_v15 }
  0x55   : > { %1573 = vmatprep.subr.mxu0 %v613_v12  ;;  %1627 = vmatprep.subr.mxu1 %v863_v17 }
  0x56   : > { %1574 = vmatpush3.msra.mxu0 %v613_v12  ;;  %1628 = vmatpush3.msra.mxu1 %v863_v17 }
  0x57   : > { %1575 = vmatprep.subr.mxu0 %v612_v14  ;;  %1629 = vmatprep.subr.mxu1 %v862_v20 }
  0x58   : > { %1576 = vmatpush3.msra.mxu0 %v612_v14  ;;  %1630 = vmatpush3.msra.mxu1 %v862_v20 }
  0x59   : > { %1577 = vmatprep.subr.mxu0 %v611_v16  ;;  %1631 = vmatprep.subr.mxu1 %v861_v34 }
  0x5a   : > { %1578 = vmatpush3.msra.mxu0 %v611_v16  ;;  %1632 = vmatpush3.msra.mxu1 %v861_v34 }
  0x5b   : > { %1580 = vmatmul.mubr.f32.vlgmr.msra.gmra.mxu0 %v632_v18  ;;  %1633 = vmatprep.subr.mxu1 %v860_v35 }
  0x5c   : > { %1582 = vmatprep.mubr.f32.mxu0 %v633_v19  ;;  %1634 = vmatpush3.msra.mxu1 %v860_v35 }
  0x5f   : > { %1583 = vmatmul.mubr.f32.gmra.mxu0 %v634_v21 }
  0x60   : > { %1585 = vmatprep.mubr.f32.mxu0 %v635_v22 }
  0x63   : > { %1586 = vmatmul.mubr.f32.gmra.mxu0 %v636_v23 }
  0x64   : > { %1588 = vmatprep.mubr.f32.mxu0 %v637_v24 }
  0x67   : > { %1589 = vmatmul.mubr.f32.gmra.mxu0 %v638_v25 }
  0x68   : > { %1591 = vmatprep.mubr.f32.mxu0 %v639_v26 }
  0x6b   : > { %1592 = vmatmul.mubr.f32.gmra.mxu0 %v640_v27 }
  0x6c   : > { %1594 = vmatprep.mubr.f32.mxu0 %v641_v28 }
  0x6f   : > { %1595 = vmatmul.mubr.f32.gmra.mxu0 %v642_v29 }
  0x70   : > { %1597 = vmatprep.mubr.f32.mxu0 %v643_v30 }
  0x73   : > { %1598 = vmatmul.mubr.f32.gmra.mxu0 %v644_v31 }
  0x74   : > { %1600 = vmatprep.mubr.f32.mxu0 %v645_v32 }
  0x77   : > { %1601 = vmatmul.mubr.f32.gmra.mxu0 %v646_v33 }
 0x11b   : > { %v1581_v36 = vpop.f32.mrf.mxu0 }
 0x11d   : > { %v729_v37 = vpop.f32.mrf.mxu0 }
 0x11e   : > { %1635 = vmatprep.mubr.f32.mxu1 %v729_v37 }
 0x11f   : > { %v1584_v38 = vpop.f32.mrf.mxu0  ;;  %1636 = vmatmul.mubr.f32.vlgmr.msra.gmra.mxu1 %v1581_v36 }
 0x121   : > { %v739_v39 = vpop.f32.mrf.mxu0 }
 0x122   : > { %1638 = vmatprep.mubr.f32.mxu1 %v739_v39 }
 0x123   : > { %v1587_v40 = vpop.f32.mrf.mxu0  ;;  %1639 = vmatmul.mubr.f32.gmra.mxu1 %v1584_v38 }
 0x125   : > { %v749_v41 = vpop.f32.mrf.mxu0 }
 0x126   : > { %1641 = vmatprep.mubr.f32.mxu1 %v749_v41 }
 0x127   : > { %v1590_v42 = vpop.f32.mrf.mxu0  ;;  %1642 = vmatmul.mubr.f32.gmra.mxu1 %v1587_v40 }
 0x129   : > { %v759_v43 = vpop.f32.mrf.mxu0 }
 0x12a   : > { %1644 = vmatprep.mubr.f32.mxu1 %v759_v43 }
 0x12b   : > { %v1593_v44 = vpop.f32.mrf.mxu0  ;;  %1645 = vmatmul.mubr.f32.gmra.mxu1 %v1590_v42 }
 0x12d   : > { %v769_v45 = vpop.f32.mrf.mxu0 }
 0x12e   : > { %1647 = vmatprep.mubr.f32.mxu1 %v769_v45 }
 0x12f   : > { %v1596_v46 = vpop.f32.mrf.mxu0  ;;  %1648 = vmatmul.mubr.f32.gmra.mxu1 %v1593_v44 }
 0x131   : > { %v779_v47 = vpop.f32.mrf.mxu0 }
 0x132   : > { %1650 = vmatprep.mubr.f32.mxu1 %v779_v47 }
 0x133   : > { %v1599_v48 = vpop.f32.mrf.mxu0  ;;  %1651 = vmatmul.mubr.f32.gmra.mxu1 %v1596_v46 }
 0x135   : > { %v789_v49 = vpop.f32.mrf.mxu0 }
 0x136   : > { %1653 = vmatprep.mubr.f32.mxu1 %v789_v49 }
 0x137   : > { %v1602_v50 = vpop.f32.mrf.mxu0  ;;  %1654 = vmatmul.mubr.f32.gmra.mxu1 %v1599_v48 }
 0x139   : > { %v799_v51 = vpop.f32.mrf.mxu0 }
 0x13a   : > { %1656 = vmatprep.mubr.f32.mxu1 %v799_v51 }
 0x13b   : > { %1657 = vmatmul.mubr.f32.gmra.mxu1 %v1602_v50 }
 0x1df   : > { %v1637_v6 = vpop.f32.mrf.mxu1 }
 0x1e0   : > { %v953_v52 = vadd.f32 %v1637_v6, %v1996_v1 }
 0x1e1   : > { %v947_v53 = vpop.f32.mrf.mxu1 }
 0x1e2   : > { %vm1027_vm0 = vcmp.ne.f32.partialorder %v953_v52, %v953_v52  ;;  %v948_v54 = vadd.f32 %v1996_v1, %v947_v53 }
 0x1e3   : > { %v1043_v55 = vsel %vm1027_vm0, 0.0, %v953_v52  ;;  %v1640_v57 = vpop.f32.mrf.mxu1 }
 0x1e4   : > { %v1436_v58 = vclamps-f32 %v1043_v55, 10.0  ;;  %vm1026_vm1 = vcmp.ne.f32.partialorder %v948_v54, %v948_v54  ;;  %v963_v59 = vadd.f32 %v1640_v57, %v1996_v1 }
 0x1e5   : > { %v1042_v61 = vsel %vm1026_vm1, 0.0, %v948_v54  ;;  %v957_v62 = vpop.f32.mrf.mxu1 }
 0x1e6   : > { %v1096_v63 = vmul.f32 %v2001_v56, %v1436_v58  ;;  %v1435_v0 = vclamps-f32 %v1042_v61, 10.0  ;;  %vm1029_vm2 = vcmp.ne.f32.partialorder %v963_v59, %v963_v59  ;;  %v958_v2 = vadd.f32 %v1996_v1, %v957_v62 }
 0x1e7   : > { %v1045_v3 = vsel %vm1029_vm2, 0.0, %v963_v59  ;;  %v1643_v4 = vpop.f32.mrf.mxu1 }
 0x1e8   : > { %v1117_v5 = vadd.f32 %v2006_v60, %v1096_v63  ;;  %v1095_v7 = vmul.f32 %v2001_v56, %v1435_v0  ;;  %v1438_v8 = vclamps-f32 %v1045_v3, 10.0  ;;  %vm1028_vm3 = vcmp.ne.f32.partialorder %v958_v2, %v958_v2 }
 0x1e9   : > { %v1044_v9 = vsel %vm1028_vm3, 0.0, %v958_v2  ;;  %v973_v10 = vadd.f32 %v1643_v4, %v1996_v1  ;;  %v967_v11 = vpop.f32.mrf.mxu1 }
 0x1ea   : > { %v1133_v12 = vmax.f32 %v1117_v5, 0.0  ;;  %v1116_v13 = vadd.f32 %v2006_v60, %v1095_v7  ;;  %v1098_v14 = vmul.f32 %v2001_v56, %v1438_v8  ;;  %v1437_v15 = vclamps-f32 %v1044_v9, 10.0 }
 0x1eb   : > { %vm1031_vm4 = vcmp.ne.f32.partialorder %v973_v10, %v973_v10  ;;  %v968_v16 = vadd.f32 %v1996_v1, %v967_v11  ;;  %v1646_v17 = vpop.f32.mrf.mxu1 }
 0x1ec   : > { %v2016_v18 = vmin.f32 %v1133_v12, 10.0  ;;  %v1132_v19 = vmax.f32 %v1116_v13, 0.0  ;;  %v1119_v20 = vadd.f32 %v2006_v60, %v1098_v14  ;;  %v1097_v21 = vmul.f32 %v2001_v56, %v1437_v15 }
 0x1ed   : > { %v1047_v22 = vsel %vm1031_vm4, 0.0, %v973_v10  ;;  %vm1030_vm5 = vcmp.ne.f32.partialorder %v968_v16, %v968_v16  ;;  %v983_v23 = vadd.f32 %v1646_v17, %v1996_v1  ;;  %v977_v24 = vpop.f32.mrf.mxu1 }
 0x1ee   : > { %1168 = vst [vmem:[%s2021_s10 + $0x8] sm:$0xff] %v2016_v18  ;;  %v2025_v25 = vmin.f32 %v1132_v19, 10.0  ;;  %v1135_v26 = vmax.f32 %v1119_v20, 0.0  ;;  %v1118_v27 = vadd.f32 %v2006_v60, %v1097_v21  ;;  %v1440_v28 = vclamps-f32 %v1047_v22, 10.0 }
 0x1ef   : > { %v1046_v29 = vsel %vm1030_vm5, 0.0, %v968_v16  ;;  %vm1033_vm6 = vcmp.ne.f32.partialorder %v983_v23, %v983_v23  ;;  %v978_v30 = vadd.f32 %v1996_v1, %v977_v24  ;;  %v1649_v31 = vpop.f32.mrf.mxu1 }
 0x1f0   : > { %1167 = vst [vmem:[%s2021_s10] sm:$0xff] %v2025_v25  ;;  %v2031_v32 = vmin.f32 %v1135_v26, 10.0  ;;  %v1134_v33 = vmax.f32 %v1118_v27, 0.0  ;;  %v1100_v34 = vmul.f32 %v2001_v56, %v1440_v28  ;;  %v1439_v35 = vclamps-f32 %v1046_v29, 10.0 }
 0x1f1   : > { %v1049_v36 = vsel %vm1033_vm6, 0.0, %v983_v23  ;;  %vm1032_vm7 = vcmp.ne.f32.partialorder %v978_v30, %v978_v30  ;;  %v993_v37 = vadd.f32 %v1649_v31, %v1996_v1  ;;  %v987_v38 = vpop.f32.mrf.mxu1 }
 0x1f2   : > { %1170 = vst [vmem:[%s2021_s10 + $0x18] sm:$0xff] %v2031_v32  ;;  %v2037_v39 = vmin.f32 %v1134_v33, 10.0  ;;  %v1121_v40 = vadd.f32 %v2006_v60, %v1100_v34  ;;  %v1099_v41 = vmul.f32 %v2001_v56, %v1439_v35  ;;  %v1442_v42 = vclamps-f32 %v1049_v36, 10.0 }
 0x1f3   : > { %v1048_v43 = vsel %vm1032_vm7, 0.0, %v978_v30  ;;  %vm1035_vm8 = vcmp.ne.f32.partialorder %v993_v37, %v993_v37  ;;  %v988_v44 = vadd.f32 %v1996_v1, %v987_v38  ;;  %v1652_v45 = vpop.f32.mrf.mxu1 }
 0x1f4   : > { %1169 = vst [vmem:[%s2021_s10 + $0x10] sm:$0xff] %v2037_v39  ;;  %v1137_v46 = vmax.f32 %v1121_v40, 0.0  ;;  %v1120_v47 = vadd.f32 %v2006_v60, %v1099_v41  ;;  %v1102_v48 = vmul.f32 %v2001_v56, %v1442_v42  ;;  %v1441_v49 = vclamps-f32 %v1048_v43, 10.0 }
 0x1f5   : > { %v1051_v50 = vsel %vm1035_vm8, 0.0, %v993_v37  ;;  %vm1034_vm9 = vcmp.ne.f32.partialorder %v988_v44, %v988_v44  ;;  %v1003_v51 = vadd.f32 %v1652_v45, %v1996_v1  ;;  %v997_v6 = vpop.f32.mrf.mxu1 }
 0x1f6   : > { %v2047_v52 = vmin.f32 %v1137_v46, 10.0  ;;  %v1136_v53 = vmax.f32 %v1120_v47, 0.0  ;;  %v1123_v54 = vadd.f32 %v2006_v60, %v1102_v48  ;;  %v1101_v55 = vmul.f32 %v2001_v56, %v1441_v49 }
 0x1f7   : > { %v1444_v57 = vclamps-f32 %v1051_v50, 10.0  ;;  %v1050_v58 = vsel %vm1034_vm9, 0.0, %v988_v44  ;;  %vm1037_vm10 = vcmp.ne.f32.partialorder %v1003_v51, %v1003_v51  ;;  %v998_v59 = vadd.f32 %v1996_v1, %v997_v6  ;;  %v1655_v61 = vpop.f32.mrf.mxu1 }
 0x1f8   : > { %1172 = vst [vmem:[%s2021_s10 + $0x28] sm:$0xff] %v2047_v52  ;;  %v2054_v62 = vmin.f32 %v1136_v53, 10.0  ;;  %v1139_v63 = vmax.f32 %v1123_v54, 0.0  ;;  %v1122_v0 = vadd.f32 %v2006_v60, %v1101_v55  ;;  %v1443_v2 = vclamps-f32 %v1050_v58, 10.0 }
 0x1f9   : > { %v1104_v3 = vmul.f32 %v2001_v56, %v1444_v57  ;;  %v1053_v4 = vsel %vm1037_vm10, 0.0, %v1003_v51  ;;  %vm1036_vm11 = vcmp.ne.f32.partialorder %v998_v59, %v998_v59  ;;  %v1013_v5 = vadd.f32 %v1655_v61, %v1996_v1  ;;  %v1007_v7 = vpop.f32.mrf.mxu1 }
 0x1fa   : > { %1171 = vst [vmem:[%s2021_s10 + $0x20] sm:$0xff] %v2054_v62  ;;  %v2061_v8 = vmin.f32 %v1139_v63, 10.0  ;;  %v1138_v9 = vmax.f32 %v1122_v0, 0.0  ;;  %v1103_v10 = vmul.f32 %v2001_v56, %v1443_v2  ;;  %v1446_v11 = vclamps-f32 %v1053_v4, 10.0 }
 0x1fb   : > { %v1125_v12 = vadd.f32 %v2006_v60, %v1104_v3  ;;  %v1052_v13 = vsel %vm1036_vm11, 0.0, %v998_v59  ;;  %vm1039_vm12 = vcmp.ne.f32.partialorder %v1013_v5, %v1013_v5  ;;  %v1008_v14 = vadd.f32 %v1996_v1, %v1007_v7  ;;  %v1658_v15 = vpop.f32.mrf.mxu1 }
 0x1fc   : > { %1174 = vst [vmem:[%s2021_s10 + $0x38] sm:$0xff] %v2061_v8  ;;  %v2068_v16 = vmin.f32 %v1138_v9, 10.0  ;;  %v1124_v17 = vadd.f32 %v2006_v60, %v1103_v10  ;;  %v1106_v19 = vmul.f32 %v2001_v56, %v1446_v11  ;;  %v1445_v20 = vclamps-f32 %v1052_v13, 10.0 }
 0x1fd   : > { %v1141_v21 = vmax.f32 %v1125_v12, 0.0  ;;  %v1055_v22 = vsel %vm1039_vm12, 0.0, %v1013_v5  ;;  %vm1038_vm13 = vcmp.ne.f32.partialorder %v1008_v14, %v1008_v14  ;;  %v1023_v23 = vadd.f32 %v1658_v15, %v1996_v1  ;;  %v1017_v24 = vpop.f32.mrf.mxu1 }
 0x1fe   : > { %1173 = vst [vmem:[%s2021_s10 + $0x30] sm:$0xff] %v2068_v16  ;;  %v1140_v26 = vmax.f32 %v1124_v17, 0.0  ;;  %v1127_v27 = vadd.f32 %v2006_v60, %v1106_v19  ;;  %v1105_v28 = vmul.f32 %v2001_v56, %v1445_v20  ;;  %v1448_v29 = vclamps-f32 %v1055_v22, 10.0 }
 0x1ff   : > { %v1157_v30 = vmin.f32 %v1141_v21, 10.0  ;;  %v1054_v31 = vsel %vm1038_vm13, 0.0, %v1008_v14  ;;  %vm1041_vm14 = vcmp.ne.f32.partialorder %v1023_v23, %v1023_v23  ;;  %v1018_v33 = vadd.f32 %v1996_v1, %v1017_v24 }
 0x200   : > { %v1156_v34 = vmin.f32 %v1140_v26, 10.0  ;;  %v1143_v35 = vmax.f32 %v1127_v27, 0.0  ;;  %v1126_v36 = vadd.f32 %v2006_v60, %v1105_v28  ;;  %v1108_v37 = vmul.f32 %v2001_v56, %v1448_v29 }
 0x201   : > { %1176 = vst [vmem:[%s2021_s10 + $0x48] sm:$0xff] %v1157_v30  ;;  %v1447_v38 = vclamps-f32 %v1054_v31, 10.0  ;;  %v1057_v40 = vsel %vm1041_vm14, 0.0, %v1023_v23  ;;  %vm1040_vm15 = vcmp.ne.f32.partialorder %v1018_v33, %v1018_v33 }
 0x202   : > { %1175 = vst [vmem:[%s2021_s10 + $0x40] sm:$0xff] %v1156_v34  ;;  %v1159_v41 = vmin.f32 %v1143_v35, 10.0  ;;  %v1142_v42 = vmax.f32 %v1126_v36, 0.0  ;;  %v1129_v43 = vadd.f32 %v2006_v60, %v1108_v37  ;;  %v1450_v44 = vclamps-f32 %v1057_v40, 10.0 }
 0x203   : > { %v1107_v1 = vmul.f32 %v2001_v56, %v1447_v38  ;;  %v1056_v45 = vsel %vm1040_vm15, 0.0, %v1018_v33 }
 0x204   : > { %1178 = vst [vmem:[%s2021_s10 + $0x58] sm:$0xff] %v1159_v41  ;;  %v1158_v46 = vmin.f32 %v1142_v42, 10.0  ;;  %v1145_v47 = vmax.f32 %v1129_v43, 0.0  ;;  %v1110_v48 = vmul.f32 %v2001_v56, %v1450_v44  ;;  %v1449_v49 = vclamps-f32 %v1056_v45, 10.0 }
 0x205   : > { %v1128_v50 = vadd.f32 %v2006_v60, %v1107_v1 }
 0x206   : > { %1177 = vst [vmem:[%s2021_s10 + $0x50] sm:$0xff] %v1158_v46  ;;  %v1161_v51 = vmin.f32 %v1145_v47, 10.0  ;;  %v1131_v6 = vadd.f32 %v2006_v60, %v1110_v48  ;;  %v1109_v53 = vmul.f32 %v2001_v56, %v1449_v49 }
 0x207   : > { %v1144_v54 = vmax.f32 %v1128_v50, 0.0 }
 0x208   : > { %1180 = vst [vmem:[%s2021_s10 + $0x68] sm:$0xff] %v1161_v51  ;;  %v1147_v55 = vmax.f32 %v1131_v6, 0.0  ;;  %v1130_v57 = vadd.f32 %v2006_v60, %v1109_v53 }
 0x209   : > { %v1160_v58 = vmin.f32 %v1144_v54, 10.0 }
 0x20a   : > { %v1163_v59 = vmin.f32 %v1147_v55, 10.0  ;;  %v1146_v61 = vmax.f32 %v1130_v57, 0.0  ;;  %1186 = sbr.rel (%p1454_p8) target bundleno = 792 (0x318), region = 64 }
 0x20b   : > { %1179 = vst [vmem:[%s2021_s10 + $0x60] sm:$0xff] %v1160_v58 }
 0x20c   : > { %1182 = vst [vmem:[%s2021_s10 + $0x78] sm:$0xff] %v1163_v59  ;;  %v1162_v63 = vmin.f32 %v1146_v61, 10.0 }
 0x20e   : > { %1181 = vst [vmem:[%s2021_s10 + $0x70] sm:$0xff] %v1162_v63 }
 0x20f   : > { %v1746_v0 = vmov 0.0   ;;  %vm1747_vm0 = vmmov 0   ;;  %v1188_v56 = vld [vmem:[%s2127_s5 + $0x1] sm:$0x1]  ;;  %v1748_v60 = vmov 0  }
 0x210   : > { %1659 = vmatprep.subr.mxu0 %v1746_v0  ;;  %1691 = vmatprep.mubr.msk.f32.mxu0 %vm1747_vm0, %v1746_v0  ;;  %v1187_v2 = vld [vmem:[%s2127_s5] sm:$0x1] }
 0x211   : > { %1660 = vmatpush3.xpose.msra.mxu0 %v1163_v59  ;;  %1721 = vset.pattern.permute.xlu0 %v1748_v60 }
 0x212   : > { %1661 = vmatprep.subr.mxu0 %v1746_v0  ;;  %1191 = vperm.xlu0 %1721, %v1188_v56  }
 0x215   : > { %1662 = vmatpush3.xpose.msra.mxu0 %v1162_v63 }
 0x216   : > { %1663 = vmatprep.subr.mxu0 %v1746_v0 }
 0x219   : > { %1664 = vmatpush3.xpose.msra.mxu0 %v1161_v51 }
 0x21a   : > { %1665 = vmatprep.subr.mxu0 %v1746_v0 }
 0x21d   : > { %1666 = vmatpush3.xpose.msra.mxu0 %v1160_v58 }
 0x21e   : > { %1667 = vmatprep.subr.mxu0 %v1746_v0 }
 0x221   : > { %1668 = vmatpush3.xpose.msra.mxu0 %v1159_v41 }
 0x222   : > { %1669 = vmatprep.subr.mxu0 %v1746_v0 }
 0x225   : > { %1670 = vmatpush3.xpose.msra.mxu0 %v1158_v46 }
 0x226   : > { %1671 = vmatprep.subr.mxu0 %v1746_v0 }
 0x229   : > { %1672 = vmatpush3.xpose.msra.mxu0 %v1157_v30 }
 0x22a   : > { %1673 = vmatprep.subr.mxu0 %v1746_v0 }
 0x22d   : > { %1674 = vmatpush3.xpose.msra.mxu0 %v1156_v34 }
 0x22e   : > { %1675 = vmatprep.subr.mxu0 %v1746_v0 }
 0x231   : > { %1676 = vmatpush3.xpose.msra.mxu0 %v2061_v8 }
 0x232   : > { %1677 = vmatprep.subr.mxu0 %v1746_v0 }
 0x235   : > { %1678 = vmatpush3.xpose.msra.mxu0 %v2068_v16 }
 0x236   : > { %1679 = vmatprep.subr.mxu0 %v1746_v0 }
 0x239   : > { %1680 = vmatpush3.xpose.msra.mxu0 %v2047_v52 }
 0x23a   : > { %1681 = vmatprep.subr.mxu0 %v1746_v0 }
 0x23d   : > { %1682 = vmatpush3.xpose.msra.mxu0 %v2054_v62 }
 0x23e   : > { %1683 = vmatprep.subr.mxu0 %v1746_v0 }
 0x241   : > { %1684 = vmatpush3.xpose.msra.mxu0 %v2031_v32 }
 0x242   : > { %1685 = vmatprep.subr.mxu0 %v1746_v0 }
 0x245   : > { %1686 = vmatpush3.xpose.msra.mxu0 %v2037_v39 }
 0x246   : > { %1687 = vmatprep.subr.mxu0 %v1746_v0 }
 0x249   : > { %1688 = vmatpush3.xpose.msra.mxu0 %v2016_v18 }
 0x24a   : > { %1689 = vmatprep.subr.mxu0 %v1746_v0 }
 0x24d   : > { %1690 = vmatpush3.xpose.msra.mxu0 %v2025_v25 }
 0x250   : > { %1692 = vmatmul.mubr.f32.vlgmr.msra.gmra.mxu0 %v1187_v2 }
 0x28d   : > { %v1192_v52 = vpop.permute.xlu0 %1191 }
 0x310   : > { %v1260_v3 = vpop.f32.mrf.mxu0 }
 0x311   : > { %v1261_v62 = vadd.f32 %v1260_v3, %v1192_v52 }
 0x312   : > { %v1693_v4 = vpop.f32.mrf.mxu0 }
 0x313   : > { %vm1264_vm1 = vcmp.ne.f32.partialorder %v1261_v62, %v1261_v62 }
 0x314   : > { %v1265_v32 = vsel %vm1264_vm1, 0.0, %v1261_v62 }
 0x315   : > { %v1455_v5 = vclamps-f32 %v1265_v32, 10.0 }
 0x317   : > { %1268 = vst [vmem:[%s2128_s6] sm:$0x1] %v1455_v5 }
 0x318 PF: > { %s16_s23 = sadd.s32 1, %s1744_s23   ;;  %s2129_s21 = smov %s1740_s22 }
 0x319   : > { %p13_p9 = scmp.ge.s32.totalorder %s16_s23, 5   ;;  %s2130_s22 = smov %s2132_s24 }
 0x31b   :  { %15 = sbr.rel (!%p13_p9) target bundleno = 2 (0x2), region = 104 }

</bundles_post_ra>
